<compile_context>
chip_gen: v7x
topology: tpu7x:2x2x1
jax: 0.10.0
libtpu: 0.0.40
codegen_flags: <defaults>
</compile_context>

<pallas_src>
import math
import functools

import jax
import jax.numpy as jnp
from jax import lax
from jax.experimental import pallas as pl
from jax.experimental.pallas import tpu as pltpu


def _cross_attn_kernel(q_ref, kv_ref, mask_ref,
                       wq_ref, bq_ref, wk_ref, bk_ref, wv_ref, bv_ref,
                       wp_ref, bp_ref, out_ref, acc_ref, *, scale):
    """One (batch, query-tile, head) grid step.

    q_ref   : (TQ, C)    query activations (compute dtype)
    kv_ref  : (T2, C)    key/value activations (compute dtype)
    mask_ref: (1, T2)    multiplicative mask, f32
    wq/wk/wv: (C, hd)    per-head projection weights;  bq/bk/bv: (1, hd)
    wp_ref  : (hd, O)    per-head rows of the output projection; bp_ref: (1, O)
    out_ref : (TQ, O)    output tile (written on the last head)
    acc_ref : (TQ, O)    f32 scratch accumulator over heads
    """
    h = pl.program_id(2)

    @pl.when(h == 0)
    def _init():
        acc_ref[...] = jnp.zeros_like(acc_ref)

    x_q = q_ref[...]                       # (TQ, C)
    x_kv = kv_ref[...]                     # (T2, C)
    cdt = x_q.dtype                        # compute dtype fed to the MXU

    # Per-head linear projections (f32 accumulation on the MXU).
    q = jnp.dot(x_q, wq_ref[...], preferred_element_type=jnp.float32) + bq_ref[...]
    k = jnp.dot(x_kv, wk_ref[...], preferred_element_type=jnp.float32) + bk_ref[...]
    v = jnp.dot(x_kv, wv_ref[...], preferred_element_type=jnp.float32) + bv_ref[...]

    # Fold the 1/sqrt(hd) scale into q (O(TQ*hd) instead of O(TQ*T2)).
    q = (q * scale).astype(cdt)
    k = k.astype(cdt)
    v = v.astype(cdt)

    # Scores: q @ k^T via dot_general contracting dims (no explicit transpose).
    att = lax.dot_general(q, k, (((1,), (1,)), ((), ())),
                          preferred_element_type=jnp.float32)        # (TQ, T2)

    # PyTorch semantics: multiplicative mask applied BEFORE softmax.
    att = mask_ref[...] * att

    # Numerically stable softmax over T2, all in f32 (v5e-friendly).
    att = att - jnp.max(att, axis=-1, keepdims=True)
    e = jnp.exp(att)
    p = e * pl.reciprocal(jnp.sum(e, axis=-1, keepdims=True), approx=True)
    # TODO(synk): attention dropout (attn_pdrop) is identity in eval mode; omitted.

    y = jnp.dot(p.astype(cdt), v, preferred_element_type=jnp.float32)  # (TQ, hd)

    # Accumulate this head's slice of the output projection.
    acc_ref[...] += jnp.dot(y.astype(cdt), wp_ref[...],
                            preferred_element_type=jnp.float32)

    @pl.when(h == pl.num_programs(2) - 1)
    def _finalize():
        out_ref[...] = (acc_ref[...] + bp_ref[...]).astype(out_ref.dtype)


def _pick_tq(t1):
    for cand in (512, 256, 128):
        if t1 % cand == 0:
            return cand
    return t1


def visual_lang_cross_attention(query_states, key_value_states, kv_attention_mask,
                                params, n_head, *, compute_dtype=None, tq=None):
    """params: PyTorch-convention Linear weights (out, in) and biases (out,)."""
    B, T1, C = query_states.shape
    _, T2, _ = key_value_states.shape
    assert C % n_head == 0
    hd = C // n_head
    O = params["wp"].shape[0]

    out_dtype = query_states.dtype
    cdt = jnp.dtype(compute_dtype) if compute_dtype is not None else jnp.dtype(out_dtype)

    if tq is None:
        tq = _pick_tq(T1)
    qb = pl.cdiv(T1, tq)

    # ---- wrapper-side layout glue (plain XLA, one-time) -----------------
    def head_major_w(w):                       # (C_out, C_in) -> (H, C_in, hd)
        return jnp.transpose(w.T.reshape(C, n_head, hd), (1, 0, 2)).astype(cdt)

    def head_major_b(b):                       # (C,) -> (H, 1, hd)
        return b.reshape(n_head, 1, hd).astype(cdt)

    wq_h = head_major_w(params["wq"]); bq_h = head_major_b(params["bq"])
    wk_h = head_major_w(params["wk"]); bk_h = head_major_b(params["bk"])
    wv_h = head_major_w(params["wv"]); bv_h = head_major_b(params["bv"])
    wp_h = params["wp"].T.reshape(n_head, hd, O).astype(cdt)   # per-head rows of proj
    bp2 = params["bp"].reshape(1, O).astype(jnp.float32)

    xq = query_states.astype(cdt)
    xkv = key_value_states.astype(cdt)
    if kv_attention_mask is None:
        kv_attention_mask = jnp.ones((B, T2), jnp.float32)
    mask3 = kv_attention_mask.reshape(B, 1, T2).astype(jnp.float32)

    # ---- cost estimate (advisory, helps XLA scheduling) -----------------
    isz = jnp.dtype(cdt).itemsize
    flops = int(2 * B * (T1 * C * C + 2 * T2 * C * C + 2 * T1 * T2 * C + T1 * C * O))
    transcendentals = int(B * n_head * T1 * T2)
    bytes_accessed = int(isz * (B * T1 * C + B * T2 * C + 3 * C * C + C * O)
                         + 4 * (B * T2 + O)
                         + jnp.dtype(out_dtype).itemsize * B * T1 * O)

    kernel = functools.partial(_cross_attn_kernel, scale=1.0 / math.sqrt(hd))

    out = pl.pallas_call(
        kernel,
        out_shape=jax.ShapeDtypeStruct((B, T1, O), out_dtype),
        grid=(B, qb, n_head),
        in_specs=[
            pl.BlockSpec((None, tq, C), lambda b, qi, h: (b, qi, 0)),   # query
            pl.BlockSpec((None, T2, C), lambda b, qi, h: (b, 0, 0)),    # key/value
            pl.BlockSpec((None, 1, T2), lambda b, qi, h: (b, 0, 0)),    # mask
            pl.BlockSpec((None, C, hd), lambda b, qi, h: (h, 0, 0)),    # Wq (head h)
            pl.BlockSpec((None, 1, hd), lambda b, qi, h: (h, 0, 0)),    # bq
            pl.BlockSpec((None, C, hd), lambda b, qi, h: (h, 0, 0)),    # Wk
            pl.BlockSpec((None, 1, hd), lambda b, qi, h: (h, 0, 0)),    # bk
            pl.BlockSpec((None, C, hd), lambda b, qi, h: (h, 0, 0)),    # Wv
            pl.BlockSpec((None, 1, hd), lambda b, qi, h: (h, 0, 0)),    # bv
            pl.BlockSpec((None, hd, O), lambda b, qi, h: (h, 0, 0)),    # Wproj rows
            pl.BlockSpec((1, O), lambda b, qi, h: (0, 0)),              # bproj
        ],
        out_specs=pl.BlockSpec((None, tq, O), lambda b, qi, h: (b, qi, 0)),
        scratch_shapes=[pltpu.VMEM((tq, O), jnp.float32)],
        compiler_params=pltpu.CompilerParams(
            dimension_semantics=("parallel", "parallel", "arbitrary"),
            vmem_limit_bytes=48 * 1024 * 1024),
        cost_estimate=pl.CostEstimate(flops=flops,
                                      transcendentals=transcendentals,
                                      bytes_accessed=bytes_accessed),
    )(xq, xkv, mask3, wq_h, bq_h, wk_h, bk_h, wv_h, bv_h, wp_h, bp2)
    # TODO(synk): for very long T2 on v7x, stream K/V over a T2 grid axis with an
    # online-softmax accumulator instead of materializing full (T2, C) tiles.
    return out


def _reference(query_states, key_value_states, kv_attention_mask, params, n_head):
    """Pure-JAX mirror of the PyTorch forward (eval mode)."""
    B, T1, C = query_states.shape
    _, T2, _ = key_value_states.shape
    hd = C // n_head

    def lin(x, w, b):
        return x @ w.T + b

    q = lin(query_states, params["wq"], params["bq"]).reshape(B, T1, n_head, hd).transpose(0, 2, 1, 3)
    k = lin(key_value_states, params["wk"], params["bk"]).reshape(B, T2, n_head, hd).transpose(0, 2, 1, 3)
    v = lin(key_value_states, params["wv"], params["bv"]).reshape(B, T2, n_head, hd).transpose(0, 2, 1, 3)
    att = jnp.einsum("bhqd,bhkd->bhqk", q, k) * (1.0 / math.sqrt(hd))
    att = kv_attention_mask.reshape(B, 1, 1, T2) * att
    att = jax.nn.softmax(att, axis=-1)
    y = jnp.einsum("bhqk,bhkd->bhqd", att, v).transpose(0, 2, 1, 3).reshape(B, T1, C)
    return lin(y, params["wp"], params["bp"])


if __name__ == "__main__":
    B, T1, T2, C, n_head, output_size = 2, 8, 16, 32, 4, 32

    key = jax.random.PRNGKey(0)
    keys = jax.random.split(key, 16)

    query_states = jax.random.normal(keys[0], (B, T1, C), jnp.float32)
    key_value_states = jax.random.normal(keys[1], (B, T2, C), jnp.float32)
    kv_attention_mask = (jax.random.uniform(keys[2], (B, T2)) > 0.3).astype(jnp.float32)

    def linear_init(kw, kb, out_f, in_f):
        bound = 1.0 / math.sqrt(in_f)
        w = jax.random.uniform(kw, (out_f, in_f), jnp.float32, -bound, bound)
        b = jax.random.uniform(kb, (out_f,), jnp.float32, -bound, bound)
        return w, b

    wq, bq = linear_init(keys[3], keys[4], C, C)
    wk, bk = linear_init(keys[5], keys[6], C, C)
    wv, bv = linear_init(keys[7], keys[8], C, C)
    wp, bp = linear_init(keys[9], keys[10], output_size, C)
    params = dict(wq=wq, bq=bq, wk=wk, bk=bk, wv=wv, bv=bv, wp=wp, bp=bp)

    ref = _reference(query_states, key_value_states, kv_attention_mask, params, n_head)

    # f32 path (tight check; tolerance accounts for approx reciprocal in softmax).
    out = visual_lang_cross_attention(query_states, key_value_states,
                                      kv_attention_mask, params, n_head)
    out = jax.block_until_ready(out)
    assert out.shape == (B, T1, output_size)
    assert jnp.max(jnp.abs(out - ref)) < 2e-3, "f32 kernel mismatch vs reference"

    # bf16 MXU path (fast path on v6e/v7x; f32 softmax + f32 accumulation).
    out_bf16 = visual_lang_cross_attention(query_states, key_value_states,
                                           kv_attention_mask, params, n_head,
                                           compute_dtype=jnp.bfloat16)
    out_bf16 = jax.block_until_ready(out_bf16)
    assert out_bf16.shape == (B, T1, output_size)
    assert jnp.max(jnp.abs(out_bf16.astype(jnp.float32) - ref)) < 5e-2, \
        "bf16 kernel mismatch vs reference"

    print("KERNEL_OK")
</pallas_src>

<mosaic_0001>
module attributes {stable_mosaic.version = 11 : i64} {
  func.func @_cross_attn_kernel(%arg0: i32, %arg1: i32, %arg2: i32, %arg3: memref<1x8x32xf32, #tpu.memory_space<vmem>>, %arg4: memref<1x16x32xf32, #tpu.memory_space<vmem>>, %arg5: memref<1x1x16xf32, #tpu.memory_space<vmem>>, %arg6: memref<1x32x8xf32, #tpu.memory_space<vmem>>, %arg7: memref<1x1x8xf32, #tpu.memory_space<vmem>>, %arg8: memref<1x32x8xf32, #tpu.memory_space<vmem>>, %arg9: memref<1x1x8xf32, #tpu.memory_space<vmem>>, %arg10: memref<1x32x8xf32, #tpu.memory_space<vmem>>, %arg11: memref<1x1x8xf32, #tpu.memory_space<vmem>>, %arg12: memref<1x8x32xf32, #tpu.memory_space<vmem>>, %arg13: memref<1x32xf32, #tpu.memory_space<vmem>>, %arg14: memref<1x8x32xf32, #tpu.memory_space<vmem>>, %arg15: memref<8x32xf32, #tpu.memory_space<vmem>>) attributes {dimension_semantics = [#tpu.dimension_semantics<parallel>, #tpu.dimension_semantics<parallel>, #tpu.dimension_semantics<arbitrary>], iteration_bounds = array<i64: 2, 1, 4>, scalar_prefetch = 0 : i64, scratch_operands = 1 : i64, tpu.core_type = #tpu.core_type<tc>, window_params = [{transform_indices = @transform_0, window_bounds = array<i64: 1, 8, 32>}, {transform_indices = @transform_1, window_bounds = array<i64: 1, 16, 32>}, {transform_indices = @transform_2, window_bounds = array<i64: 1, 1, 16>}, {transform_indices = @transform_3, window_bounds = array<i64: 1, 32, 8>}, {transform_indices = @transform_4, window_bounds = array<i64: 1, 1, 8>}, {transform_indices = @transform_5, window_bounds = array<i64: 1, 32, 8>}, {transform_indices = @transform_6, window_bounds = array<i64: 1, 1, 8>}, {transform_indices = @transform_7, window_bounds = array<i64: 1, 32, 8>}, {transform_indices = @transform_8, window_bounds = array<i64: 1, 1, 8>}, {transform_indices = @transform_9, window_bounds = array<i64: 1, 8, 32>}, {pipeline_mode = #tpu.pipeline_mode<synchronous>, transform_indices = @transform_10, window_bounds = array<i64: 1, 32>}, {transform_indices = @transform_11, window_bounds = array<i64: 1, 8, 32>}]} {
    %c0_i32 = arith.constant 0 : i32
    %0 = arith.cmpi eq, %arg2, %c0_i32 : i32
    %1 = arith.extui %0 : i1 to i32
    %c0_i32_0 = arith.constant 0 : i32
    %2 = arith.cmpi ne, %1, %c0_i32_0 : i32
    scf.if %2 {
      %cst_43 = arith.constant 0.000000e+00 : f32
      %55 = vector.broadcast %cst_43 : f32 to vector<8x32xf32>
      %c0_44 = arith.constant 0 : index
      %c0_45 = arith.constant 0 : index
      %56 = vector.load %arg15[%c0_44, %c0_45] : memref<8x32xf32, #tpu.memory_space<vmem>>, vector<8x32xf32>
      tpu.vector_store %arg15[%c0_44, %c0_45], %55 {strides = array<i32>} : memref<8x32xf32, #tpu.memory_space<vmem>>, vector<8x32xf32>,
    } else {
    }
    %c0 = arith.constant 0 : index
    %c0_1 = arith.constant 0 : index
    %c0_2 = arith.constant 0 : index
    %3 = vector.load %arg3[%c0, %c0_1, %c0_2] : memref<1x8x32xf32, #tpu.memory_space<vmem>>, vector<1x8x32xf32>
    %4 = vector.shape_cast %3 : vector<1x8x32xf32> to vector<8x32xf32>
    %c0_3 = arith.constant 0 : index
    %c0_4 = arith.constant 0 : index
    %c0_5 = arith.constant 0 : index
    %5 = vector.load %arg4[%c0_3, %c0_4, %c0_5] : memref<1x16x32xf32, #tpu.memory_space<vmem>>, vector<1x16x32xf32>
    %6 = vector.shape_cast %5 : vector<1x16x32xf32> to vector<16x32xf32>
    %c0_6 = arith.constant 0 : index
    %c0_7 = arith.constant 0 : index
    %c0_8 = arith.constant 0 : index
    %7 = vector.load %arg6[%c0_6, %c0_7, %c0_8] : memref<1x32x8xf32, #tpu.memory_space<vmem>>, vector<1x32x8xf32>
    %8 = vector.shape_cast %7 : vector<1x32x8xf32> to vector<32x8xf32>
    %cst = arith.constant dense<0.000000e+00> : vector<8x8xf32>
    %9 = tpu.matmul %4, %8, %cst {dimension_numbers = #tpu.dot_dimension_numbers<[1], [0], [0], [1], [0, 0, 1, 1], [], []>} : vector<8x32xf32>, vector<32x8xf32>, vector<8x8xf32> -> vector<8x8xf32>
    %c0_9 = arith.constant 0 : index
    %c0_10 = arith.constant 0 : index
    %c0_11 = arith.constant 0 : index
    %10 = vector.load %arg7[%c0_9, %c0_10, %c0_11] : memref<1x1x8xf32, #tpu.memory_space<vmem>>, vector<1x1x8xf32>
    %11 = vector.shape_cast %10 : vector<1x1x8xf32> to vector<1x8xf32>
    %12 = vector.broadcast %11 : vector<1x8xf32> to vector<8x8xf32>
    %13 = arith.addf %9, %12 : vector<8x8xf32>
    %c0_12 = arith.constant 0 : index
    %c0_13 = arith.constant 0 : index
    %c0_14 = arith.constant 0 : index
    %14 = vector.load %arg8[%c0_12, %c0_13, %c0_14] : memref<1x32x8xf32, #tpu.memory_space<vmem>>, vector<1x32x8xf32>
    %15 = vector.shape_cast %14 : vector<1x32x8xf32> to vector<32x8xf32>
    %cst_15 = arith.constant dense<0.000000e+00> : vector<16x8xf32>
    %16 = tpu.matmul %6, %15, %cst_15 {dimension_numbers = #tpu.dot_dimension_numbers<[1], [0], [0], [1], [0, 0, 1, 1], [], []>} : vector<16x32xf32>, vector<32x8xf32>, vector<16x8xf32> -> vector<16x8xf32>
    %c0_16 = arith.constant 0 : index
    %c0_17 = arith.constant 0 : index
    %c0_18 = arith.constant 0 : index
    %17 = vector.load %arg9[%c0_16, %c0_17, %c0_18] : memref<1x1x8xf32, #tpu.memory_space<vmem>>, vector<1x1x8xf32>
    %18 = vector.shape_cast %17 : vector<1x1x8xf32> to vector<1x8xf32>
    %19 = vector.broadcast %18 : vector<1x8xf32> to vector<16x8xf32>
    %20 = arith.addf %16, %19 : vector<16x8xf32>
    %c0_19 = arith.constant 0 : index
    %c0_20 = arith.constant 0 : index
    %c0_21 = arith.constant 0 : index
    %21 = vector.load %arg10[%c0_19, %c0_20, %c0_21] : memref<1x32x8xf32, #tpu.memory_space<vmem>>, vector<1x32x8xf32>
    %22 = vector.shape_cast %21 : vector<1x32x8xf32> to vector<32x8xf32>
    %cst_22 = arith.constant dense<0.000000e+00> : vector<16x8xf32>
    %23 = tpu.matmul %6, %22, %cst_22 {dimension_numbers = #tpu.dot_dimension_numbers<[1], [0], [0], [1], [0, 0, 1, 1], [], []>} : vector<16x32xf32>, vector<32x8xf32>, vector<16x8xf32> -> vector<16x8xf32>
    %c0_23 = arith.constant 0 : index
    %c0_24 = arith.constant 0 : index
    %c0_25 = arith.constant 0 : index
    %24 = vector.load %arg11[%c0_23, %c0_24, %c0_25] : memref<1x1x8xf32, #tpu.memory_space<vmem>>, vector<1x1x8xf32>
    %25 = vector.shape_cast %24 : vector<1x1x8xf32> to vector<1x8xf32>
    %26 = vector.broadcast %25 : vector<1x8xf32> to vector<16x8xf32>
    %27 = arith.addf %23, %26 : vector<16x8xf32>
    %cst_26 = arith.constant 0.353553385 : f32
    %28 = vector.broadcast %cst_26 : f32 to vector<8x8xf32>
    %29 = arith.mulf %13, %28 : vector<8x8xf32>
    %cst_27 = arith.constant dense<0.000000e+00> : vector<8x16xf32>
    %30 = tpu.matmul %29, %20, %cst_27 {dimension_numbers = #tpu.dot_dimension_numbers<[1], [1], [0], [0], [0, 0, 1, 0], [], []>} : vector<8x8xf32>, vector<16x8xf32>, vector<8x16xf32> -> vector<8x16xf32>
    %c0_28 = arith.constant 0 : index
    %c0_29 = arith.constant 0 : index
    %c0_30 = arith.constant 0 : index
    %31 = vector.load %arg5[%c0_28, %c0_29, %c0_30] : memref<1x1x16xf32, #tpu.memory_space<vmem>>, vector<1x1x16xf32>
    %32 = vector.shape_cast %31 : vector<1x1x16xf32> to vector<1x16xf32>
    %33 = vector.broadcast %32 : vector<1x16xf32> to vector<8x16xf32>
    %34 = arith.mulf %33, %30 : vector<8x16xf32>
    %cst_31 = arith.constant dense<0xFF800000> : vector<8xf32>
    %35 = vector.multi_reduction <maximumf>, %34, %cst_31 [1] : vector<8x16xf32> to vector<8xf32>
    %36 = vector.shape_cast %35 : vector<8xf32> to vector<8x1xf32>
    %37 = vector.broadcast %36 : vector<8x1xf32> to vector<8x16xf32>
    %38 = arith.subf %34, %37 : vector<8x16xf32>
    %39 = math.exp %38 : vector<8x16xf32>
    %cst_32 = arith.constant dense<0.000000e+00> : vector<8xf32>
    %40 = vector.multi_reduction <add>, %39, %cst_32 [1] : vector<8x16xf32> to vector<8xf32>
    %41 = vector.shape_cast %40 : vector<8xf32> to vector<8x1xf32>
    %42 = tpu.reciprocal %41 {approx = true} : vector<8x1xf32> -> vector<8x1xf32>
    %43 = vector.broadcast %42 : vector<8x1xf32> to vector<8x16xf32>
    %44 = arith.mulf %39, %43 : vector<8x16xf32>
    %cst_33 = arith.constant dense<0.000000e+00> : vector<8x8xf32>
    %45 = tpu.matmul %44, %27, %cst_33 {dimension_numbers = #tpu.dot_dimension_numbers<[1], [0], [0], [1], [0, 0, 1, 1], [], []>} : vector<8x16xf32>, vector<16x8xf32>, vector<8x8xf32> -> vector<8x8xf32>
    %c0_34 = arith.constant 0 : index
    %c0_35 = arith.constant 0 : index
    %46 = vector.load %arg15[%c0_34, %c0_35] : memref<8x32xf32, #tpu.memory_space<vmem>>, vector<8x32xf32>
    %c0_36 = arith.constant 0 : index
    %c0_37 = arith.constant 0 : index
    %c0_38 = arith.constant 0 : index
    %47 = vector.load %arg12[%c0_36, %c0_37, %c0_38] : memref<1x8x32xf32, #tpu.memory_space<vmem>>, vector<1x8x32xf32>
    %48 = vector.shape_cast %47 : vector<1x8x32xf32> to vector<8x32xf32>
    %cst_39 = arith.constant dense<0.000000e+00> : vector<8x32xf32>
    %49 = tpu.matmul %45, %48, %cst_39 {dimension_numbers = #tpu.dot_dimension_numbers<[1], [0], [0], [1], [0, 0, 1, 1], [], []>} : vector<8x8xf32>, vector<8x32xf32>, vector<8x32xf32> -> vector<8x32xf32>
    %50 = arith.addf %46, %49 : vector<8x32xf32>
    %c0_40 = arith.constant 0 : index
    %c0_41 = arith.constant 0 : index
    %51 = vector.load %arg15[%c0_40, %c0_41] : memref<8x32xf32, #tpu.memory_space<vmem>>, vector<8x32xf32>
    tpu.vector_store %arg15[%c0_40, %c0_41], %50 {strides = array<i32>} : memref<8x32xf32, #tpu.memory_space<vmem>>, vector<8x32xf32>,
    %c3_i32 = arith.constant 3 : i32
    %52 = arith.cmpi eq, %arg2, %c3_i32 : i32
    %53 = arith.extui %52 : i1 to i32
    %c0_i32_42 = arith.constant 0 : i32
    %54 = arith.cmpi ne, %53, %c0_i32_42 : i32
    scf.if %54 {
      %c0_43 = arith.constant 0 : index
      %c0_44 = arith.constant 0 : index
      %55 = vector.load %arg15[%c0_43, %c0_44] : memref<8x32xf32, #tpu.memory_space<vmem>>, vector<8x32xf32>
      %c0_45 = arith.constant 0 : index
      %c0_46 = arith.constant 0 : index
      %56 = vector.load %arg13[%c0_45, %c0_46] : memref<1x32xf32, #tpu.memory_space<vmem>>, vector<1x32xf32>
      %57 = vector.broadcast %56 : vector<1x32xf32> to vector<8x32xf32>
      %58 = arith.addf %55, %57 : vector<8x32xf32>
      %c0_47 = arith.constant 0 : index
      %c0_48 = arith.constant 0 : index
      %c0_49 = arith.constant 0 : index
      %59 = vector.load %arg14[%c0_47, %c0_48, %c0_49] : memref<1x8x32xf32, #tpu.memory_space<vmem>>, vector<1x8x32xf32>
      %60 = vector.shape_cast %59 : vector<1x8x32xf32> to vector<8x32xf32>
      %61 = vector.shape_cast %58 : vector<8x32xf32> to vector<1x8x32xf32>
      tpu.vector_store %arg14[%c0_47, %c0_48, %c0_49], %61 {strides = array<i32>} : memref<1x8x32xf32, #tpu.memory_space<vmem>>, vector<1x8x32xf32>,
    } else {
    }
    return
  }
  func.func @transform_0(%arg0: i32, %arg1: i32, %arg2: i32) -> (i32, i32, i32) {
    %c0_i32 = arith.constant 0 : i32
    %c0_i32_0 = arith.constant 0 : i32
    return %arg0, %arg1, %c0_i32 : i32, i32, i32
  }
  func.func @transform_1(%arg0: i32, %arg1: i32, %arg2: i32) -> (i32, i32, i32) {
    %c0_i32 = arith.constant 0 : i32
    %c0_i32_0 = arith.constant 0 : i32
    %c0_i32_1 = arith.constant 0 : i32
    return %arg0, %c0_i32, %c0_i32_0 : i32, i32, i32
  }
  func.func @transform_2(%arg0: i32, %arg1: i32, %arg2: i32) -> (i32, i32, i32) {
    %c0_i32 = arith.constant 0 : i32
    %c0_i32_0 = arith.constant 0 : i32
    %c0_i32_1 = arith.constant 0 : i32
    return %arg0, %c0_i32, %c0_i32_0 : i32, i32, i32
  }
  func.func @transform_3(%arg0: i32, %arg1: i32, %arg2: i32) -> (i32, i32, i32) {
    %c0_i32 = arith.constant 0 : i32
    %c0_i32_0 = arith.constant 0 : i32
    %c0_i32_1 = arith.constant 0 : i32
    return %arg2, %c0_i32, %c0_i32_0 : i32, i32, i32
  }
  func.func @transform_4(%arg0: i32, %arg1: i32, %arg2: i32) -> (i32, i32, i32) {
    %c0_i32 = arith.constant 0 : i32
    %c0_i32_0 = arith.constant 0 : i32
    %c0_i32_1 = arith.constant 0 : i32
    return %arg2, %c0_i32, %c0_i32_0 : i32, i32, i32
  }
  func.func @transform_5(%arg0: i32, %arg1: i32, %arg2: i32) -> (i32, i32, i32) {
    %c0_i32 = arith.constant 0 : i32
    %c0_i32_0 = arith.constant 0 : i32
    %c0_i32_1 = arith.constant 0 : i32
    return %arg2, %c0_i32, %c0_i32_0 : i32, i32, i32
  }
  func.func @transform_6(%arg0: i32, %arg1: i32, %arg2: i32) -> (i32, i32, i32) {
    %c0_i32 = arith.constant 0 : i32
    %c0_i32_0 = arith.constant 0 : i32
    %c0_i32_1 = arith.constant 0 : i32
    return %arg2, %c0_i32, %c0_i32_0 : i32, i32, i32
  }
  func.func @transform_7(%arg0: i32, %arg1: i32, %arg2: i32) -> (i32, i32, i32) {
    %c0_i32 = arith.constant 0 : i32
    %c0_i32_0 = arith.constant 0 : i32
    %c0_i32_1 = arith.constant 0 : i32
    return %arg2, %c0_i32, %c0_i32_0 : i32, i32, i32
  }
  func.func @transform_8(%arg0: i32, %arg1: i32, %arg2: i32) -> (i32, i32, i32) {
    %c0_i32 = arith.constant 0 : i32
    %c0_i32_0 = arith.constant 0 : i32
    %c0_i32_1 = arith.constant 0 : i32
    return %arg2, %c0_i32, %c0_i32_0 : i32, i32, i32
  }
  func.func @transform_9(%arg0: i32, %arg1: i32, %arg2: i32) -> (i32, i32, i32) {
    %c0_i32 = arith.constant 0 : i32
    %c0_i32_0 = arith.constant 0 : i32
    %c0_i32_1 = arith.constant 0 : i32
    return %arg2, %c0_i32, %c0_i32_0 : i32, i32, i32
  }
  func.func @transform_10(%arg0: i32, %arg1: i32, %arg2: i32) -> (i32, i32) {
    %c0_i32 = arith.constant 0 : i32
    %c0_i32_0 = arith.constant 0 : i32
    %c0_i32_1 = arith.constant 0 : i32
    return %c0_i32, %c0_i32_0 : i32, i32
  }
  func.func @transform_11(%arg0: i32, %arg1: i32, %arg2: i32) -> (i32, i32, i32) {
    %c0_i32 = arith.constant 0 : i32
    %c0_i32_0 = arith.constant 0 : i32
    return %arg0, %arg1, %c0_i32 : i32, i32, i32
  }
}

</mosaic_0001>

<bundles_post_ra>
// kernel: tpu_custom_call.1
= control target key start
LH: loop header
LB: loop body
LE: loop exit
PB: predicated region body
PF: predicated region fallthrough
CT: control target
= control target key end

     0   :  { %s1922_s0 = inlined_call_operand.vmem [shape: f32[2,8,32], index: 0, kind: input, shape index: {}]   ;;  %s1923_s1 = inlined_call_operand.vmem [shape: f32[2,16,32], index: 1, kind: input, shape index: {}]   ;;  %s1924_s2 = inlined_call_operand.vmem [shape: f32[2,1,16], index: 2, kind: input, shape index: {}]   ;;  %s1925_s3 = inlined_call_operand.vmem [shape: f32[4,32,8], index: 3, kind: input, shape index: {}]   ;;  %s1926_s4 = inlined_call_operand.vmem [shape: f32[4,1,8], index: 4, kind: input, shape index: {}]   ;;  %s1927_s5 = inlined_call_operand.vmem [shape: f32[4,32,8], index: 5, kind: input, shape index: {}]   ;;  %s1928_s6 = inlined_call_operand.vmem [shape: f32[4,1,8], index: 6, kind: input, shape index: {}]   ;;  %s1929_s7 = inlined_call_operand.vmem [shape: f32[4,32,8], index: 7, kind: input, shape index: {}]   ;;  %s1930_s8 = inlined_call_operand.vmem [shape: f32[4,1,8], index: 8, kind: input, shape index: {}]   ;;  %s1931_s9 = inlined_call_operand.vmem [shape: f32[4,8,32], index: 9, kind: input, shape index: {}]   ;;  %s1932_s10 = inlined_call_operand.vmem [shape: f32[1,32], index: 10, kind: input, shape index: {}]   ;;  %s1933_s11 = inlined_call_operand.hbm [shape: f32[2,8,32], index: 11, kind: output, shape index: {}]  }
   0x1   :  { %1948 = sst [smem:[#allocation18_spill]] %s1922_s0 }
   0x2   :  { %1949 = sst [smem:[#allocation19_spill]] %s1923_s1 }
   0x3   :  { %1950 = sst [smem:[#allocation20_spill]] %s1925_s3 }
   0x4   :  { %1951 = sst [smem:[#allocation21_spill]] %s1932_s10 }
   0x5   :  { %1952 = sst [smem:[#allocation22_spill]] %s1933_s11 }
   0x6   :  { %16 = vsyncpa [#allocation4], 0 }
   0x7   :  { %18 = vsyncpa [#allocation4 + $0x1], 0  ;;  %s1679_s17 = smov 0   ;;  %s1681_s18 = smov 0  }
   0x8   :  { %s1683_s19 = smov 0   ;;  %s1685_s20 = smov 0  }
   0x9   :  { %s1687_s21 = smov 0   ;;  %s1689_s22 = smov 0  }
   0xa   :  { %s1691_s23 = smov 0   ;;  %s1693_s24 = smov 0  }
   0xb LB: > { %1953 = sst [smem:[#allocation6_spill]] %s1584_s17  ;;  %s1292_s25 = sadd.s32 4294967295, %s1612_s24   ;;  %s1612_s24 = sphi %s1693_s24, %s24_s24   ;;  %s1608_s23 = sphi %s1691_s23, %s1988_s23   ;;  %s1604_s22 = sphi %s1689_s22, %s1987_s22   ;;  %s1600_s21 = sphi %s1687_s21, %s1986_s21   ;;  %s1596_s20 = sphi %s1685_s20, %s1985_s20   ;;  %s1592_s19 = sphi %s1683_s19, %s1984_s19   ;;  %s1588_s18 = sphi %s1681_s18, %s1983_s18   ;;  %s1584_s17 = sphi %s1679_s17, %s1982_s17  }
   0xc   : > { %1954 = sst [smem:[#allocation7_spill]] %s1588_s18  ;;  %s1293_s26 = sadd.s32 4294967294, %s1612_s24  }
   0xd   : > { %1955 = sst [smem:[#allocation8_spill]] %s1592_s19  ;;  %s36_s27 = sadd.s32 1, %s1604_s22 }
   0xe   : > { %1956 = sst [smem:[#allocation9_spill]] %s1600_s21  ;;  %p37_p0 = scmp.ge.s32.totalorder %s36_s27, 4 }
   0xf   : > { %1957 = sst [smem:[#allocation10_spill]] %s1604_s22  ;;  %s43_s28 = sadd.s32 1, %s1608_s23 }
  0x10   : > { %1958 = sst [smem:[#allocation11_spill]] %s1608_s23  ;;  %p345_p1 = scmp.ne.s32.totalorder %s1592_s19, %s1588_s18 }
  0x11   : > { %1959 = sst [smem:[#allocation12_spill]] %s1612_s24  ;;  %p346_p2 = scmp.eq.s32.totalorder %s1292_s25, 7 }
  0x12   : > { %s1990_s27 = smov (%p37_p0, %s36_s27), 0  ;;  %s1992_s28 = smov (!%p37_p0, %s43_s28), %s1608_s23 }
  0x13   : > { %1960 = sst [smem:[#allocation13_spill]] %s1990_s27  ;;  %p1728_p3 = por %p346_p2, %p345_p1 }
  0x14   : > { %p351_p4 = scmp.ne.s32.totalorder %s1588_s18, %s1584_s17  ;;  %p45_p5 = scmp.ge.s32.totalorder %s1992_s28, 2 }
  0x15   : > { %s1961_s29 = scalar_select %p1728_p3, 1, 0 }
  0x16   : > { %p352_p6 = scmp.eq.s32.totalorder %s1293_s26, 7  ;;  %p1296_p7 = scmp.ge.s32.totalorder %s1612_s24, 1 }
  0x17   : > { %1962 = sst [smem:[#allocation14_spill]] %s1961_s29  ;;  %p446_p8 = scmp.lt.s32.totalorder %s1612_s24, 9 }
  0x18   : > { %s1994_s28 = smov (%p45_p5, %s1992_s28), 0  ;;  %p1738_p9 = por %p352_p6, %p351_p4 }
  0x19   : > { %1963 = sst [smem:[#allocation15_spill]] %s1994_s28  ;;  %p447_p10 = pnand %p1296_p7, %p446_p8 }
  0x1a   : > { %s1964_s30 = scalar_select %p1738_p9, 1, 0 }
  0x1b   : > { %s330_s12 = ssub.s32 %s1608_s23, %s1994_s28  ;;  %s335_s13 = sadd.s32 1, %s1592_s19 }
  0x1c   : > { %1965 = sst [smem:[#allocation16_spill]] %s1964_s30  ;;  %p333_p11 = scmp.eq.s32.totalorder %s330_s12, 0 }
  0x1d   : > { %450 = sbr.rel (%p447_p10) target bundleno = 1276 (0x4fc), region = 64  ;;  %s1935_s15 = sand.u32 (!%p447_p10), 1, %s1588_s18  }
  0x1e   : > { %s1746_s14 = scalar_select %p333_p11, %s1592_s19, %s335_s13  }
  0x1f   : > { %p524_p12 = scmp.lt.s32.totalorder (!%p447_p10), %s1600_s21, 1  ;;  %s1752_s16 = sshll.u32 (!%p447_p10), %s1935_s15, 3 }
  0x20   : > { %1966 = sst [smem:[#allocation17_spill]] %s1746_s14  ;;  %p539_p13 = scmp.lt.s32.totalorder (!%p447_p10), %s1596_s20, 3 }
  0x21   : > { %s1967_s0 = sld [smem:[#allocation18_spill]] (!%p447_p10)  ;;  %s1968_s1 = sld [smem:[#allocation19_spill]] (!%p447_p10) }
  0x22   : > { %s1969_s3 = sld [smem:[#allocation20_spill]] (!%p447_p10)  ;;  %s523_s28 = scalar_lea.vmem (!%p447_p10), [#allocation3], %s1752_s16 }
  0x23   : > { %p1308_p0 = scmp.ne.s32.totalorder (!%p447_p10), %s1596_s20, 0 }
  0x24   : > { %s1756_s25 = scalar_select %p524_p12, %s1600_s21, 1 }
  0x25   : > { %s1759_s26 = scalar_select %p539_p13, %s1596_s20, 3 }
  0x26   : > { %s1298_s12 = sshll.u32 %s1756_s25, 3  ;;  %s1329_s13 = sshll.u32 %s1756_s25, 4  ;;  %vm571_vm0 = vcmask (!%p1308_p0), 261120   ;;  %v1614_v0 = vmov (!%p1308_p0), 0.0  }
  0x27   : > { %s1766_s15 = scalar_lea.vmem %s1967_s0, %s1298_s12  ;;  %s1771_s14 = scalar_lea.vmem %s1968_s1, %s1329_s13  ;;  %572 = vst.msk [vmem:[#allocation2] sm:$0xff] (!%p1308_p0), %vm571_vm0, %v1614_v0 }
  0x28   : > { %s1330_s24 = sshll.u32 %s1759_s26, 5  ;;  %s554_s0 = scalar_lea.vmem %s1928_s6, %s1759_s26 }
  0x29   : > { %s1781_s18 = scalar_lea.vmem %s1969_s3, %s1330_s24  ;;  %s551_s22 = scalar_lea.vmem %s1927_s5, %s1330_s24 }
  0x2a   : > { %s1797_s17 = scalar_lea.vmem %s1929_s7, %s1330_s24  ;;  %s562_s1 = scalar_lea.vmem %s1930_s8, %s1759_s26 }
  0x2b   : > { %s1307_s3 = sshll.u32 %s1759_s26, 3  ;;  %570 = sbr.rel (%p1308_p0) target bundleno = 50 (0x32), region = 68 }
  0x2c   : > { %s1807_s27 = scalar_lea.vmem %s1931_s9, %s1307_s3 }
  0x32 PF: > { %v661_v1 = vld [vmem:[%s551_s22] sm:$0xff]  ;;  %v662_v2 = vld [vmem:[%s551_s22 + $0x8] sm:$0xff]  ;;  %v663_v3 = vld [vmem:[%s551_s22 + $0x10] sm:$0xff]  ;;  %vm587_vm1 = vcmask 261120   ;;  %v1615_v6 = vmov 0.0|0.0   ;;  %vm1616_vm2 = vmmov 0  }
  0x33   : > { %v1416_v4 = vpack.c.bf16 %v662_v2, %v661_v1  ;;  %v664_v5 = vld [vmem:[%s551_s22 + $0x18] sm:$0xff]  ;;  %1410 = vmatprep.subr.bf16.mxu0 %v1615_v6  ;;  %v574_v7 = vld [vmem:[%s1771_s14] sm:$0xff]  ;;  %v577_v10 = vld [vmem:[%s1781_s18 + $0x8] sm:$0xff]  ;;  %v1617_v12 = vmov 0.0   ;;  %vm840_vm3 = vcmask 64512   ;;  %s1971_s22 = scalar_lea.vmem %s1924_s2, %s1756_s25  ;;  %vm928_vm5 = vcmask 130048  }
  0x34   : > { %v576_v8 = vld [vmem:[%s1781_s18] sm:$0xff]  ;;  %v1420_v9 = vpack.c.bf16 %v664_v5, %v663_v3  ;;  %1377 = vmatprep.mubr.msk.f32.mxu1 %vm587_vm1, %v574_v7  ;;  %v578_v11 = vld [vmem:[%s1781_s18 + $0x10] sm:$0xff]  ;;  %1366 = vmatprep.mubr.msk.f32.mxu0 %vm1616_vm2, %v1617_v12  ;;  %v579_v14 = vld [vmem:[%s1781_s18 + $0x18] sm:$0xff]  ;;  %p1323_p1 = scmp.ne.s32.totalorder %s1596_s20, 3 }
  0x35   : > { %1417 = vmatprep.subr.bf16.mxu1 %v1416_v4  ;;  %v1411_v13 = vpack.c.bf16 %v577_v10, %v576_v8  ;;  %v1414_v15 = vpack.c.bf16 %v579_v14, %v578_v11  ;;  %v575_v16 = vld [vmem:[%s1771_s14 + $0x8] sm:$0xff]  ;;  %v573_v17 = vld [vmem:[%s1766_s15] sm:$0xff]  ;;  %s1970_s15 = scalar_lea.vmem %s1926_s4, %s1759_s26  ;;  %vm1434_vm4 = vmpackc.low %vm840_vm3, %vm840_vm3 }
  0x36   : > { %1419 = vmatpush3.bf16.msra.mxu1 %v1416_v4  ;;  %v1311_v18 = vld [vmem:[%s554_s0] ss:$0 sm:$0xff]  ;;  %v754_v30 = vld [vmem:[%s1797_s17 + $0x8] sm:$0xff]  ;;  %v755_v31 = vld [vmem:[%s1797_s17 + $0x10] sm:$0xff] }
  0x37   : > { %1421 = vmatprep.subr.bf16.mxu1 %v1420_v9  ;;  %1412 = vmatpush3.bf16.msra.mxu0 %v1411_v13  ;;  %v1309_v24 = vld [vmem:[%s1970_s15] ss:$0 sm:$0xff]  ;;  %v756_v33 = vld [vmem:[%s1797_s17 + $0x18] sm:$0xff] }
  0x38   : > { %1413 = vmatprep.subr.bf16.mxu0 %v1615_v6  ;;  %v753_v29 = vld [vmem:[%s1797_s17] sm:$0xff]  ;;  %v1428_v34 = vpack.c.bf16 %v756_v33, %v755_v31 }
  0x39   : > { %v1424_v32 = vpack.c.bf16 %v754_v30, %v753_v29  ;;  %v1320_v35 = vld [vmem:[%s1971_s22] ss:$0 sm:$0xff] }
  0x3a   : > { %1423 = vmatpush3.bf16.msra.mxu1 %v1420_v9  ;;  %v1314_v46 = vld [vmem:[%s562_s1] ss:$0 sm:$0xff] }
  0x3b   : > { %1415 = vmatpush3.bf16.msra.mxu0 %v1414_v15  ;;  %1432 = vmatprep.subr.bf16.mxu1 %v1615_v6  ;;  %v1014_v51 = vld [vmem:[%s1807_s27] sm:$0xff]  ;;  %s1972_s27 = sld [smem:[#allocation21_spill]] (!%p1323_p1) }
  0x3c   : > { %1425 = vmatprep.subr.bf16.mxu0 %v1424_v32  ;;  %v1013_v57 = vld [vmem:[#allocation2] sm:$0xff] }
  0x3d   : > { %1378 = vmatmul.mubr.msk.f32.vlgmr.msra.gmra.mrb[0].mxu1 %vm587_vm1, %v575_v16 }
  0x3e   : > { %1367 = vmatmul.mubr.msk.f32.vlgmr.msra.gmra.mrb[0].mxu0 %vm587_vm1, %v573_v17  ;;  %1395 = vmatprep.mubr.msk.f32.mxu1 %vm1616_vm2, %v1617_v12 }
  0x3f   : > { %1388 = vmatprep.mubr.msk.f32.mxu0 %vm587_vm1, %v574_v7  ;;  %1427 = vmatpush3.bf16.msra.mxu0 %v1424_v32 }
  0x40   : > { %1429 = vmatprep.subr.bf16.mxu0 %v1428_v34 }
  0x41   : > { %v1324_v62 = vld [vmem:[%s1972_s27] ss:$0 sm:$0xff] (!%p1323_p1) }
  0x43   : > { %1431 = vmatpush3.bf16.msra.mxu0 %v1428_v34 }
  0x44   : > { %1436 = vmatprep.subr.bf16.mxu0 %v1615_v6 }
  0x46   : > { %1389 = vmatmul.mubr.msk.f32.vlgmr.msra.gmra.mrb[2].mxu0 %vm587_vm1, %v575_v16 }
  0x47   : > { %1402 = vmatprep.mubr.msk.f32.mxu0 %vm1616_vm2, %v1617_v12 }
 0x110   : > { %v1379_v19 = vpop.f32.mrb[0].mxu1 }
 0x111   : > { %v750_v20 = vadd.f32 %v1379_v19, %v1311_v18  ;;  %v744_v21 = vpop.f32.mrb[1].mxu1  ;;  %v657_v22 = vpop.f32.mrb[0].mxu0 }
 0x112   : > { %v745_v23 = vadd.f32 %v1311_v18, %v744_v21  ;;  %v1368_v25 = vpop.f32.mrb[1].mxu0  ;;  %v658_v27 = vadd.f32 %v1309_v24, %v657_v22 }
 0x114   : > { %v1433_v26 = vpack.c.bf16 %v750_v20, %v745_v23  ;;  %v839_v28 = vmul.f32 0.35355338, %v658_v27 }
 0x116   : > { %1435 = vmatpush3.bf16.xpose.msk.msra.mxu1 %vm1434_vm4, %v1433_v26 }
 0x117   : > { %1405 = vmatprep.subr.mxu1 %v1617_v12 }
 0x119   : > { %v1390_v45 = vpop.f32.mrb[2].mxu0 }
 0x11a   : > { %v830_v47 = vpop.f32.mrb[3].mxu0  ;;  %v836_v48 = vadd.f32 %v1390_v45, %v1314_v46 }
 0x11b   : > { %v831_v49 = vadd.f32 %v1314_v46, %v830_v47 }
 0x11d   : > { %1396 = vmatmul.mubr.msk.f32.vlgmr.msra.gmra.mrb[2].mxu1 %vm840_vm3, %v839_v28  ;;  %v1437_v50 = vpack.c.bf16 %v836_v48, %v831_v49 }
 0x11e   : > { %1407 = vmatprep.mubr.msk.f32.mxu1 %vm1616_vm2, %v1617_v12  ;;  %1406 = vmatpush3.msra.mxu1 %v1014_v51 }
 0x11f   : > { %1438 = vmatpush3.bf16.msra.mxu0 %v1437_v50 }
 0x1f0   : > { %v916_v36 = vpop.f32.mrb[2].mxu1 }
 0x1f1   : > { %v927_v37 = vmul.f32 %v1320_v35, %v916_v36  ;;  %v1397_v38 = vpop.f32.mrb[3].mxu1 }
 0x1f3   : > { %v929_v39 = vsel %vm928_vm5, %v927_v37, -inf }
 0x1f4   : > { %930 = vmax.xlane.f32.xlu0 %v929_v39 }
 0x281   : > { %v931_v40 = vpop.xlane.xlu0 %930 }
 0x282   : > { %v932_v41 = vsub.f32 %v927_v37, %v931_v40 }
 0x284   : > { %v933_v42 = vmul.f32 1.442695, %v932_v41 }
 0x286   : > { %1514 = vpow2.f32 %v933_v42 }
 0x290   : > { %v1515_v43 = vpop.eup %1514 }
 0x291   : > { %v935_v44 = vsel %vm928_vm5, %v1515_v43, 0.0 }
 0x292   : > { %936 = vadd.xlane.f32.xlu0 %v935_v44 }
 0x31f   : > { %v937_v52 = vpop.xlane.xlu0 %936 }
 0x320   : > { %1516 = vrcp.f32 %v937_v52 }
 0x32a   : > { %v1517_v53 = vpop.eup %1516 }
 0x32b   : > { %v939_v54 = vmul.f32 %v1517_v53, %v1515_v43 }
 0x32d   : > { %1403 = vmatmul.mubr.msk.f32.vlgmr.msra.gmra.mrb[4].mxu0 %vm928_vm5, %v939_v54 }
 0x400   : > { %v1009_v55 = vpop.f32.mrb[4].mxu0 }
 0x401   : > { %v1404_v56 = vpop.f32.mrb[5].mxu0  ;;  %1408 = vmatmul.mubr.msk.f32.vlgmr.msra.gmra.mrb[4].mxu1 %vm840_vm3, %v1009_v55 }
 0x4d1   : > { %1093 = sbr.rel (%p1323_p1) target bundleno = 1250 (0x4e2), region = 72 }
 0x4d4   : > { %v1084_v58 = vpop.f32.mrb[4].mxu1 }
 0x4d5   : > { %v1088_v59 = vadd.f32 %v1084_v58, %v1013_v57  ;;  %v1409_v60 = vpop.f32.mrb[5].mxu1 }
 0x4d7   : > { %1089 = vst.msk [vmem:[#allocation2] sm:$0xff] %vm587_vm1, %v1088_v59 }
 0x4de   : > { %v1094_v61 = vld [vmem:[#allocation2] sm:$0xff] }
 0x4df   : > { %v1102_v63 = vadd.f32 %v1324_v62, %v1094_v61 }
 0x4e1   : > { %1103 = vst.msk [vmem:[%s523_s28] sm:$0xff] %vm587_vm1, %v1102_v63 }
 0x4e2 PF: > { %s1973_s23 = sld [smem:[#allocation9_spill]]  ;;  %s1976_s20 = sld [smem:[#allocation22_spill]] }
 0x4e3   : > { %s1974_s13 = sld [smem:[#allocation7_spill]]  ;;  %s1119_s3 = sshll.u32 %s523_s28, 4  ;;  %s1120_s3 = int_to_ptr.vmem [resolvable:$true] %s1119_s3 }
 0x4e4   : > { %s1518_s14 = scalar_lea.vmem %s1120_s3, 128  ;;  %s1618_s15 = smov [#allocation3]  }
 0x4e5   : > { %p1519_p2 = scmp.ne.s32.totalorder %s1120_s3, %s1518_s14  ;;  %s1522_s0 = sshll.u32 %s1618_s15, 4  ;;  %s1523_s0 = int_to_ptr.vmem [resolvable:$false] %s1522_s0 }
 0x4e6   : > { %s1524_s12 = scalar_lea.vmem %s1523_s0, 256  ;;  %p1525_p6 = scmp.lt.s32.totalorder %s1120_s3, %s1523_s0 }
 0x4e7   : > { %p1520_p4 = pnand %p1519_p2, %p1728_p3  ;;  %p1526_p7 = scmp.lt.s32.totalorder %s1524_s12, %s1518_s14 }
 0x4e8   : > { %s1326_s30 = sshll.u32 %s1973_s23, 7  ;;  %s1977_s10 = smov %s1976_s20 }
 0x4e9   : > { %s1871_s21 = scalar_lea.hbm %s1976_s20, %s1326_s30  ;;  %s1978_s18 = sand.u32 1, %s1974_s13  }
 0x4ea   : > { %s1105_s24 = scalar_lea.sflag [#allocation4], %s1978_s18  ;;  %p1521_p5 = pneg %p1520_p4 }
 0x4eb   : > { %p1527_p8 = por %p1526_p7, %p1525_p6 }
 0x4ed   : > { %p1528_p10 = pnand %p1527_p8, %p1521_p5 }
 0x4ef   : > { %1531 = shalt.err (!%p1528_p10)
}
 0x4f0   : > { %s1532_s16 = scalar_lea.hbm %s1871_s21, 128  ;;  %s1536_s17 = scalar_lea.hbm %s1977_s10, 256 }
 0x4f1   : > { %p1533_p11 = scmp.ne.s32.totalorder %s1871_s21, %s1532_s16  ;;  %p1537_p0 = scmp.lt.u32.totalorder %s1871_s21, %s1977_s10 }
 0x4f2   : > { %p1538_p1 = scmp.lt.u32.totalorder %s1536_s17, %s1532_s16  ;;  %p1540_p4 = scmp.lt.u32.totalorder %s1532_s16, %s1871_s21 }
 0x4f3   : > { %p1534_p12 = pnand %p1533_p11, %p1728_p3 }
 0x4f4   : > { %p1539_p2 = por %p1538_p1, %p1537_p0 }
 0x4f5   : > { %p1535_p13 = pneg %p1534_p12 }
 0x4f6   : > { %p1541_p5 = por %p1540_p4, %p1539_p2 }
 0x4f8   : > { %p1542_p6 = pnand %p1541_p5, %p1535_p13 }
 0x4fa   : > { %1545 = shalt.err (!%p1542_p6)
}
 0x4fb   : > { %1439 = dma.vmem_to_hbm [thread:$0]  (%p1728_p3), %s1120_s3, 128, %s1871_s21, %s1105_s24  }
 0x4fc PF: > { %s1979_s26 = sld [smem:[#allocation12_spill]]  ;;  %s1980_s27 = sld [smem:[#allocation6_spill]] }
 0x502   : > { %p1445_p7 = scmp.ge.s32.totalorder %s1979_s26, 2  ;;  %s1131_s13 = sand.u32 1, %s1980_s27  }
 0x503   : > { %s1132_s30 = scalar_lea.sflag [#allocation4], %s1131_s13 }
 0x504   : > { %p1442_p8 = pnand %p1445_p7, %p1738_p9 }
 0x506   : > { %1579 = dma.done.wait (!%p1442_p8), %s1132_s30, 128  }
 0x507   : > { %1581 = vsyncadd (!%p1442_p8), %s1132_s30, 4294967168  ;;  %s24_s24 = sadd.s32 1, %s1979_s26   ;;  %s1982_s17 = sld [smem:[#allocation7_spill]] }
 0x508   : > { %p21_p10 = scmp.ge.s32.totalorder %s24_s24, 10   ;;  %s1983_s18 = sld [smem:[#allocation8_spill]] }
 0x509   : > { %s1984_s19 = sld [smem:[#allocation17_spill]]  ;;  %s1985_s20 = sld [smem:[#allocation10_spill]] }
 0x50a   : > { %s1986_s21 = sld [smem:[#allocation11_spill]]  ;;  %s1987_s22 = sld [smem:[#allocation13_spill]] }
 0x50b   : > { %s1988_s23 = sld [smem:[#allocation15_spill]]  ;;  %23 = sbr.rel (!%p21_p10) target bundleno = 11 (0xb), region = 134 }
 0x512   :  { %1137 = vsyncpa [#allocation4], 1 }
 0x513   :  { %1139 = vsyncpa [#allocation4 + $0x1], 1 }

</bundles_post_ra>
